<compile_context>
chip_gen: v5e
topology: v5e:2x2
jax: 0.10.0
libtpu: 0.0.40
codegen_flags: <defaults>
</compile_context>

<pallas_src>
import functools

import jax
import jax.numpy as jnp
from jax.experimental import pallas as pl
from jax.experimental.pallas import tpu as pltpu


def _round_up(x, m):
    return ((x + m - 1) // m) * m


def _vmem_capacity_bytes():
    """Per-core VMEM capacity; conservative (v7x) fallback if undetectable."""
    try:
        info = pltpu.get_tpu_info()
        cap = getattr(info, "vmem_capacity_bytes", None)
        if cap:
            return int(cap)
    except Exception:
        pass
    return 64 * 1024 * 1024


# -----------------------------------------------------------------------------
# Kernel 1: feature transform  XW = X @ W   (row-tiled, W resident in VMEM)
# x_both is pass-stacked along the lane axis: [n_pad, P*Fin] -> [n_pad, P*Fout]
# grid = (P, n_pad // tm)
# -----------------------------------------------------------------------------
def _transform_kernel(x_ref, w_ref, o_ref):
    o_ref[...] = jnp.dot(
        x_ref[...], w_ref[...], preferred_element_type=jnp.float32
    ).astype(o_ref.dtype)


def _transform(x_both, w, *, num_passes, tm, vmem_limit, out_dtype=jnp.bfloat16):
    n_pad = x_both.shape[0]
    f_in, f_out = w.shape
    assert x_both.shape[1] == num_passes * f_in
    return pl.pallas_call(
        _transform_kernel,
        out_shape=jax.ShapeDtypeStruct((n_pad, num_passes * f_out), out_dtype),
        grid_spec=pltpu.PrefetchScalarGridSpec(
            num_scalar_prefetch=0,
            grid=(num_passes, n_pad // tm),
            in_specs=[
                pl.BlockSpec((tm, f_in), lambda p, i: (i, p)),
                pl.BlockSpec((f_in, f_out), lambda p, i: (0, 0)),
            ],
            out_specs=pl.BlockSpec((tm, f_out), lambda p, i: (i, p)),
        ),
        compiler_params=pltpu.CompilerParams(
            dimension_semantics=("parallel", "parallel"),
            vmem_limit_bytes=vmem_limit,
        ),
    )(x_both, w)


# -----------------------------------------------------------------------------
# Kernel 2a: aggregation, k axis collapsed (tk = n_pad): one reduction step per
# row tile, XW fully VMEM-resident, no accumulator scratch.
# -----------------------------------------------------------------------------
def _agg_kernel_single(a_ref, xw_ref, b_ref, o_ref, *, apply_relu):
    h = jnp.dot(a_ref[...], xw_ref[...], preferred_element_type=jnp.float32)
    h = h + b_ref[...]
    if apply_relu:
        h = jnp.maximum(h, 0.0)
    o_ref[...] = h.astype(o_ref.dtype)


def _aggregate_collapsed(a_p, xw, bias, *, apply_relu, tm, vmem_limit, out_dtype):
    n_pad = a_p.shape[0]
    cols = xw.shape[1]
    kern = functools.partial(_agg_kernel_single, apply_relu=apply_relu)
    return pl.pallas_call(
        kern,
        out_shape=jax.ShapeDtypeStruct((n_pad, cols), out_dtype),
        grid_spec=pltpu.PrefetchScalarGridSpec(
            num_scalar_prefetch=0,
            grid=(n_pad // tm,),
            in_specs=[
                pl.BlockSpec((tm, n_pad), lambda i: (i, 0)),     # A row band
                pl.BlockSpec((n_pad, cols), lambda i: (0, 0)),   # resident XW
                pl.BlockSpec((1, cols), lambda i: (0, 0)),       # bias
            ],
            out_specs=pl.BlockSpec((tm, cols), lambda i: (i, 0)),
        ),
        compiler_params=pltpu.CompilerParams(
            dimension_semantics=("parallel",),
            vmem_limit_bytes=vmem_limit,
        ),
    )(a_p, xw, bias)


# -----------------------------------------------------------------------------
# Kernel 2b: aggregation, (row, k)-tiled with f32 scratch accumulator.
# XW is either fully VMEM-resident (sliced in-kernel by k) or streamed per k.
# -----------------------------------------------------------------------------
def _agg_kernel_multi(a_ref, xw_ref, b_ref, o_ref, acc_ref, *,
                      apply_relu, tk, resident_xw):
    k = pl.program_id(1)

    @pl.when(k == 0)
    def _init():
        acc_ref[...] = jnp.zeros_like(acc_ref)

    if resident_xw:
        start = pl.multiple_of(k * tk, tk)
        xw = xw_ref[pl.ds(start, tk), :]
    else:
        xw = xw_ref[...]

    acc_ref[...] += jnp.dot(a_ref[...], xw, preferred_element_type=jnp.float32)

    @pl.when(k == pl.num_programs(1) - 1)
    def _finish():
        h = acc_ref[...] + b_ref[...]
        if apply_relu:
            h = jnp.maximum(h, 0.0)
        o_ref[...] = h.astype(o_ref.dtype)


def _aggregate_tiled(a_p, xw, bias, *, apply_relu, tm, tk, resident_xw,
                     vmem_limit, out_dtype):
    n_pad = a_p.shape[0]
    cols = xw.shape[1]
    kern = functools.partial(_agg_kernel_multi, apply_relu=apply_relu,
                             tk=tk, resident_xw=resident_xw)
    if resident_xw:
        xw_spec = pl.BlockSpec((n_pad, cols), lambda i, k: (0, 0))
    else:
        xw_spec = pl.BlockSpec((tk, cols), lambda i, k: (k, 0))
    return pl.pallas_call(
        kern,
        out_shape=jax.ShapeDtypeStruct((n_pad, cols), out_dtype),
        grid_spec=pltpu.PrefetchScalarGridSpec(
            num_scalar_prefetch=0,
            grid=(n_pad // tm, n_pad // tk),
            in_specs=[
                pl.BlockSpec((tm, tk), lambda i, k: (i, k)),
                xw_spec,
                pl.BlockSpec((1, cols), lambda i, k: (0, 0)),
            ],
            out_specs=pl.BlockSpec((tm, cols), lambda i, k: (i, 0)),
            scratch_shapes=[pltpu.VMEM((tm, cols), jnp.float32)],
        ),
        compiler_params=pltpu.CompilerParams(
            dimension_semantics=("parallel", "arbitrary"),
            vmem_limit_bytes=vmem_limit,
        ),
    )(a_p, xw, bias)


# -----------------------------------------------------------------------------
# Tiling plan (per graph size, per detected VMEM capacity)
# -----------------------------------------------------------------------------
def _plan(n, *, cols_max, fp, hp):
    cap = _vmem_capacity_bytes()
    budget = cap // 2                      # leave headroom for Mosaic internals

    if n <= 512:
        # Tiny graphs: single full-array block; round rows to 16 (bf16 sublanes).
        n_pad = _round_up(n, 16)
        agg = dict(mode="collapsed", n_pad=n_pad, tm=n_pad)
        est = (2 * n_pad * n_pad * 2 + 2 * n_pad * cols_max * 2
               + 2 * n_pad * cols_max * 4 + 2 * 8 * cols_max * 4)
    else:
        agg, est = None, 0
        # Mid-size: collapse the k axis (single reduction step per row tile).
        # Require >= 2 row tiles so the parallel axis can split across v7x TCs.
        for tm in (1024, 512, 256):
            n_pad = _round_up(n, tm)
            if n_pad // tm < 2:
                continue
            e = (2 * tm * n_pad * 2            # A row band, double-buffered
                 + 2 * n_pad * cols_max * 2    # resident XW (2 buffers)
                 + 2 * tm * cols_max * 4       # output tile (f32 worst case)
                 + 2 * 8 * cols_max * 4)       # bias
            if e <= budget:
                agg, est = dict(mode="collapsed", n_pad=n_pad, tm=tm), e
                break
        if agg is None:
            # Large graphs: big (tm, tk) tiles; keep XW resident if it fits.
            tm, tk = 512, 2048
            n_pad = _round_up(n, tk)
            base = (2 * tm * tk * 2 + 2 * tm * cols_max * 4
                    + tm * cols_max * 4 + 2 * 8 * cols_max * 4)
            resident = base + 2 * n_pad * cols_max * 2
            if resident <= budget:
                agg, est = dict(mode="tiled", n_pad=n_pad, tm=tm, tk=tk,
                                resident_xw=True), resident
            else:
                agg, est = dict(mode="tiled", n_pad=n_pad, tm=tm, tk=tk,
                                resident_xw=False), base + 2 * tk * cols_max * 2

    # Transform row tile: independent of the aggregation tile; as large as fits.
    n_pad = agg["n_pad"]
    f_max = max(fp, hp)
    tm_t = 8
    for t in (2048, 1024, 512, 256, 128, 64, 32, 16, 8):
        if n_pad % t:
            continue
        if (2 * t * f_max * 2 + 2 * fp * hp * 2 + 2 * t * f_max * 2) <= budget:
            tm_t = t
            break

    vmem_limit = int(min(int(0.9 * cap), max(est + (16 << 20), 48 << 20)))
    agg.update(tm_t=tm_t, vmem_limit=vmem_limit)
    return agg


def _pad_adjacency(a_hat, n_pad):
    """Pad + cast A_hat to bf16 ONCE; reuse across all forward calls."""
    n = a_hat.shape[0]
    return (jnp.zeros((n_pad, n_pad), jnp.bfloat16)
            .at[:n, :n].set(a_hat.astype(jnp.bfloat16)))


# -----------------------------------------------------------------------------
# Full fused 2-layer GCN forward for P feature sets sharing one adjacency.
# -----------------------------------------------------------------------------
def _gcn_forward(a_p, feats_list, w1, b1, w2, b2, *, plan):
    num_passes = len(feats_list)
    n, f = feats_list[0].shape
    n_hidden = w2.shape[1]
    hp = _round_up(n_hidden, 128)
    fp = _round_up(f, 128)
    n_pad = plan["n_pad"]
    bf16, f32 = jnp.bfloat16, jnp.float32

    x_both = jnp.zeros((n_pad, num_passes * fp), bf16)
    for p, x in enumerate(feats_list):
        x_both = x_both.at[:n, p * fp:p * fp + f].set(x.astype(bf16))

    w1_p = jnp.zeros((fp, hp), bf16).at[:f, :n_hidden].set(w1.astype(bf16))
    w2_p = jnp.zeros((hp, hp), bf16).at[:n_hidden, :n_hidden].set(w2.astype(bf16))

    def pad_bias(b):
        bb = jnp.zeros((1, num_passes * hp), f32)
        for p in range(num_passes):
            bb = bb.at[0, p * hp:p * hp + n_hidden].set(b.reshape(-1).astype(f32))
        return bb

    b1_b, b2_b = pad_bias(b1), pad_bias(b2)
    vmem_limit = plan["vmem_limit"]

    def aggregate(xw, bias, apply_relu, out_dtype):
        if plan["mode"] == "collapsed":
            return _aggregate_collapsed(
                a_p, xw, bias, apply_relu=apply_relu, tm=plan["tm"],
                vmem_limit=vmem_limit, out_dtype=out_dtype)
        return _aggregate_tiled(
            a_p, xw, bias, apply_relu=apply_relu, tm=plan["tm"], tk=plan["tk"],
            resident_xw=plan["resident_xw"], vmem_limit=vmem_limit,
            out_dtype=out_dtype)

    # Layer 1: H1 = relu(A @ (X @ W1) + b1)
    xw1 = _transform(x_both, w1_p, num_passes=num_passes, tm=plan["tm_t"],
                     vmem_limit=vmem_limit, out_dtype=bf16)
    h1 = aggregate(xw1, b1_b, True, bf16)
    # Layer 2: H2 = A @ (H1 @ W2) + b2
    hw2 = _transform(h1, w2_p, num_passes=num_passes, tm=plan["tm_t"],
                     vmem_limit=vmem_limit, out_dtype=bf16)
    h2 = aggregate(hw2, b2_b, False, f32)

    return [h2[:n, p * hp:p * hp + n_hidden] for p in range(num_passes)]


class DGIEncoder:
    """Mirrors Encoder.forward(g, features, corrupt); plans tiles and prepares
    the padded bf16 adjacency once, reused across calls / training steps."""

    def __init__(self, a_hat, params, max_passes=2):
        self.n = a_hat.shape[0]
        self.params = params
        w1, _, w2, _ = params
        f, n_hidden = w1.shape[0], w2.shape[1]
        hp, fp = _round_up(n_hidden, 128), _round_up(f, 128)
        self.plan = _plan(self.n, cols_max=max_passes * hp, fp=fp, hp=hp)
        self.a_p = _pad_adjacency(a_hat, self.plan["n_pad"])   # done ONCE
        plan = self.plan

        def fwd1(a_p, x, w1, b1, w2, b2):
            (o,) = _gcn_forward(a_p, [x], w1, b1, w2, b2, plan=plan)
            return o

        def fwd2(a_p, xc, xn, w1, b1, w2, b2):
            o = _gcn_forward(a_p, [xc, xn], w1, b1, w2, b2, plan=plan)
            return o[0], o[1]

        self._fwd1 = jax.jit(fwd1)
        self._fwd2 = jax.jit(fwd2)

    def __call__(self, features, corrupt=False, key=None):
        if corrupt:
            perm = jax.random.permutation(key, features.shape[0])
            features = features[perm]
        w1, b1, w2, b2 = self.params
        return self._fwd1(self.a_p, features, w1, b1, w2, b2)

    def pair(self, features, key):
        """Fused clean + corrupted DGI passes (share each A_hat tile read)."""
        perm = jax.random.permutation(key, features.shape[0])
        w1, b1, w2, b2 = self.params
        return self._fwd2(self.a_p, features, features[perm], w1, b1, w2, b2)


# -----------------------------------------------------------------------------
# Graph / parameter helpers
# -----------------------------------------------------------------------------
def normalized_adjacency(adj):
    """A_hat = D^{-1/2} (A + I) D^{-1/2}  (dense, symmetric normalization)."""
    n = adj.shape[0]
    a = adj + jnp.eye(n, dtype=adj.dtype)
    deg = a.sum(axis=1)
    d_inv_sqrt = jnp.where(deg > 0, 1.0 / jnp.sqrt(deg), 0.0)
    return a * d_inv_sqrt[:, None] * d_inv_sqrt[None, :]


def init_params(key, in_feats, n_hidden):
    k1, k2, k3, k4 = jax.random.split(key, 4)

    def glorot(k, fan_in, fan_out):
        limit = jnp.sqrt(6.0 / (fan_in + fan_out))
        return jax.random.uniform(k, (fan_in, fan_out), jnp.float32,
                                  minval=-limit, maxval=limit)

    w1 = glorot(k1, in_feats, n_hidden)
    b1 = 0.1 * jax.random.normal(k3, (n_hidden,), jnp.float32)
    w2 = glorot(k2, n_hidden, n_hidden)
    b2 = 0.1 * jax.random.normal(k4, (n_hidden,), jnp.float32)
    return w1, b1, w2, b2


if __name__ == "__main__":
    key = jax.random.PRNGKey(0)
    k_adj, k_feat, k_param, k_perm, k_adj2, k_feat2 = jax.random.split(key, 6)

    N, IN_FEATS, N_HIDDEN = 16, 32, 32

    # Synthetic random undirected graph (dense adjacency), then normalize.
    adj_rand = jax.random.uniform(k_adj, (N, N))
    adj = (adj_rand + adj_rand.T > 1.2).astype(jnp.float32)
    adj = adj * (1.0 - jnp.eye(N, dtype=jnp.float32))
    a_hat = normalized_adjacency(adj)

    features = jax.random.normal(k_feat, (N, IN_FEATS), jnp.float32)
    params = init_params(k_param, IN_FEATS, N_HIDDEN)

    enc = DGIEncoder(a_hat, params, max_passes=2)
    out = enc(features, corrupt=False)               # single clean pass
    out_pos, out_neg = enc.pair(features, k_perm)    # fused clean + corrupt
    jax.block_until_ready((out, out_pos, out_neg))

    # ----------------- references -----------------
    def ref_f32(a, x, p):
        w1, b1, w2, b2 = p
        h1 = jnp.maximum(a @ (x @ w1) + b1.reshape(1, -1), 0.0)
        return a @ (h1 @ w2) + b2.reshape(1, -1)

    def ref_bf16(a, x, p):
        bf = lambda v: v.astype(jnp.bfloat16)
        f32 = jnp.float32
        w1, b1, w2, b2 = p
        xw1 = jnp.dot(bf(x), bf(w1), preferred_element_type=f32)
        h1 = jnp.maximum(
            jnp.dot(bf(a), bf(xw1), preferred_element_type=f32) + b1.reshape(1, -1),
            0.0)
        hw2 = jnp.dot(bf(h1), bf(w2), preferred_element_type=f32)
        return jnp.dot(bf(a), bf(hw2), preferred_element_type=f32) + b2.reshape(1, -1)

    perm = jax.random.permutation(k_perm, N)
    ref_clean_bf = ref_bf16(a_hat, features, params)
    ref_neg_bf = ref_bf16(a_hat, features[perm], params)
    ref_clean_f32 = ref_f32(a_hat, features, params)

    assert out.shape == (N, N_HIDDEN)
    assert out_pos.shape == (N, N_HIDDEN)
    assert out_neg.shape == (N, N_HIDDEN)
    assert jnp.allclose(out, ref_clean_bf, atol=1e-2, rtol=1e-2), "clean mismatch"
    assert jnp.allclose(out_pos, ref_clean_bf, atol=1e-2, rtol=1e-2), "fused clean mismatch"
    assert jnp.allclose(out_neg, ref_neg_bf, atol=1e-2, rtol=1e-2), "corrupt mismatch"
    assert jnp.allclose(out, ref_clean_f32, atol=6e-2, rtol=6e-2), "f32 ref mismatch"

    # --- Exercise the large-graph tiled path (resident XW, multi-k) at a small
    #     size by overriding the plan, to keep it compile/correctness-covered.
    N2 = 200
    adj_rand2 = jax.random.uniform(k_adj2, (N2, N2))
    adj2 = (adj_rand2 + adj_rand2.T > 1.2).astype(jnp.float32)
    adj2 = adj2 * (1.0 - jnp.eye(N2, dtype=jnp.float32))
    a_hat2 = normalized_adjacency(adj2)
    feats2 = jax.random.normal(k_feat2, (N2, IN_FEATS), jnp.float32)

    plan2 = dict(mode="tiled", n_pad=256, tm=128, tk=128, resident_xw=True,
                 tm_t=256, vmem_limit=48 * 1024 * 1024)
    a_p2 = _pad_adjacency(a_hat2, plan2["n_pad"])
    (out2,) = _gcn_forward(a_p2, [feats2], *params, plan=plan2)
    jax.block_until_ready(out2)
    ref2 = ref_bf16(a_hat2, feats2, params)
    assert out2.shape == (N2, N_HIDDEN)
    assert jnp.allclose(out2, ref2, atol=2e-2, rtol=2e-2), "tiled path mismatch"

    print("KERNEL_OK")
</pallas_src>

<mosaic_0001>
module attributes {stable_mosaic.version = 11 : i64} {
  func.func @_transform_kernel(%arg0: i32, %arg1: i32, %arg2: memref<16x128xbf16, #tpu.memory_space<vmem>>, %arg3: memref<128x128xbf16, #tpu.memory_space<vmem>>, %arg4: memref<16x128xbf16, #tpu.memory_space<vmem>>) attributes {dimension_semantics = [#tpu.dimension_semantics<parallel>, #tpu.dimension_semantics<parallel>], iteration_bounds = array<i64: 1, 1>, scalar_prefetch = 0 : i64, scratch_operands = 0 : i64, tpu.core_type = #tpu.core_type<tc>, window_params = [{transform_indices = @transform_0, window_bounds = array<i64: 16, 128>}, {pipeline_mode = #tpu.pipeline_mode<synchronous>, transform_indices = @transform_1, window_bounds = array<i64: 128, 128>}, {transform_indices = @transform_2, window_bounds = array<i64: 16, 128>}]} {
    %c0 = arith.constant 0 : index
    %c0_0 = arith.constant 0 : index
    %0 = vector.load %arg2[%c0, %c0_0] : memref<16x128xbf16, #tpu.memory_space<vmem>>, vector<16x128xbf16>
    %c0_1 = arith.constant 0 : index
    %c0_2 = arith.constant 0 : index
    %1 = vector.load %arg3[%c0_1, %c0_2] : memref<128x128xbf16, #tpu.memory_space<vmem>>, vector<128x128xbf16>
    %cst = arith.constant dense<0.000000e+00> : vector<16x128xf32>
    %2 = tpu.matmul %0, %1, %cst {dimension_numbers = #tpu.dot_dimension_numbers<[1], [0], [0], [1], [0, 0, 1, 1], [], []>} : vector<16x128xbf16>, vector<128x128xbf16>, vector<16x128xf32> -> vector<16x128xf32>
    %3 = arith.truncf %2 : vector<16x128xf32> to vector<16x128xbf16>
    %c0_3 = arith.constant 0 : index
    %c0_4 = arith.constant 0 : index
    %4 = vector.load %arg4[%c0_3, %c0_4] : memref<16x128xbf16, #tpu.memory_space<vmem>>, vector<16x128xbf16>
    tpu.vector_store %arg4[%c0_3, %c0_4], %3 {strides = array<i32>} : memref<16x128xbf16, #tpu.memory_space<vmem>>, vector<16x128xbf16>,
    return
  }
  func.func @transform_0(%arg0: i32, %arg1: i32) -> (i32, i32) {
    %c0_i32 = arith.constant 0 : i32
    return %arg1, %arg0 : i32, i32
  }
  func.func @transform_1(%arg0: i32, %arg1: i32) -> (i32, i32) {
    %c0_i32 = arith.constant 0 : i32
    %c0_i32_0 = arith.constant 0 : i32
    %c0_i32_1 = arith.constant 0 : i32
    return %c0_i32, %c0_i32_0 : i32, i32
  }
  func.func @transform_2(%arg0: i32, %arg1: i32) -> (i32, i32) {
    %c0_i32 = arith.constant 0 : i32
    return %arg1, %arg0 : i32, i32
  }
}

module attributes {stable_mosaic.version = 11 : i64} {
  func.func @_agg_kernel_single(%arg0: i32, %arg1: memref<16x16xbf16, #tpu.memory_space<vmem>>, %arg2: memref<16x128xbf16, #tpu.memory_space<vmem>>, %arg3: memref<1x128xf32, #tpu.memory_space<vmem>>, %arg4: memref<16x128xbf16, #tpu.memory_space<vmem>>) attributes {dimension_semantics = [#tpu.dimension_semantics<parallel>], iteration_bounds = array<i64: 1>, scalar_prefetch = 0 : i64, scratch_operands = 0 : i64, tpu.core_type = #tpu.core_type<tc>, window_params = [{transform_indices = @transform_0, window_bounds = array<i64: 16, 16>}, {pipeline_mode = #tpu.pipeline_mode<synchronous>, transform_indices = @transform_1, window_bounds = array<i64: 16, 128>}, {pipeline_mode = #tpu.pipeline_mode<synchronous>, transform_indices = @transform_2, window_bounds = array<i64: 1, 128>}, {transform_indices = @transform_3, window_bounds = array<i64: 16, 128>}]} {
    %c0 = arith.constant 0 : index
    %c0_0 = arith.constant 0 : index
    %0 = vector.load %arg1[%c0, %c0_0] : memref<16x16xbf16, #tpu.memory_space<vmem>>, vector<16x16xbf16>
    %c0_1 = arith.constant 0 : index
    %c0_2 = arith.constant 0 : index
    %1 = vector.load %arg2[%c0_1, %c0_2] : memref<16x128xbf16, #tpu.memory_space<vmem>>, vector<16x128xbf16>
    %cst = arith.constant dense<0.000000e+00> : vector<16x128xf32>
    %2 = tpu.matmul %0, %1, %cst {dimension_numbers = #tpu.dot_dimension_numbers<[1], [0], [0], [1], [0, 0, 1, 1], [], []>} : vector<16x16xbf16>, vector<16x128xbf16>, vector<16x128xf32> -> vector<16x128xf32>
    %c0_3 = arith.constant 0 : index
    %c0_4 = arith.constant 0 : index
    %3 = vector.load %arg3[%c0_3, %c0_4] : memref<1x128xf32, #tpu.memory_space<vmem>>, vector<1x128xf32>
    %4 = vector.broadcast %3 : vector<1x128xf32> to vector<16x128xf32>
    %5 = arith.addf %2, %4 : vector<16x128xf32>
    %cst_5 = arith.constant 0.000000e+00 : f32
    %6 = vector.broadcast %cst_5 : f32 to vector<16x128xf32>
    %7 = arith.maximumf %5, %6 : vector<16x128xf32>
    %8 = arith.truncf %7 : vector<16x128xf32> to vector<16x128xbf16>
    %c0_6 = arith.constant 0 : index
    %c0_7 = arith.constant 0 : index
    %9 = vector.load %arg4[%c0_6, %c0_7] : memref<16x128xbf16, #tpu.memory_space<vmem>>, vector<16x128xbf16>
    tpu.vector_store %arg4[%c0_6, %c0_7], %8 {strides = array<i32>} : memref<16x128xbf16, #tpu.memory_space<vmem>>, vector<16x128xbf16>,
    return
  }
  func.func @transform_0(%arg0: i32) -> (i32, i32) {
    %c0_i32 = arith.constant 0 : i32
    %c0_i32_0 = arith.constant 0 : i32
    return %arg0, %c0_i32 : i32, i32
  }
  func.func @transform_1(%arg0: i32) -> (i32, i32) {
    %c0_i32 = arith.constant 0 : i32
    %c0_i32_0 = arith.constant 0 : i32
    %c0_i32_1 = arith.constant 0 : i32
    return %c0_i32, %c0_i32_0 : i32, i32
  }
  func.func @transform_2(%arg0: i32) -> (i32, i32) {
    %c0_i32 = arith.constant 0 : i32
    %c0_i32_0 = arith.constant 0 : i32
    %c0_i32_1 = arith.constant 0 : i32
    return %c0_i32, %c0_i32_0 : i32, i32
  }
  func.func @transform_3(%arg0: i32) -> (i32, i32) {
    %c0_i32 = arith.constant 0 : i32
    %c0_i32_0 = arith.constant 0 : i32
    return %arg0, %c0_i32 : i32, i32
  }
}

module attributes {stable_mosaic.version = 11 : i64} {
  func.func @_agg_kernel_single(%arg0: i32, %arg1: memref<16x16xbf16, #tpu.memory_space<vmem>>, %arg2: memref<16x128xbf16, #tpu.memory_space<vmem>>, %arg3: memref<1x128xf32, #tpu.memory_space<vmem>>, %arg4: memref<16x128xf32, #tpu.memory_space<vmem>>) attributes {dimension_semantics = [#tpu.dimension_semantics<parallel>], iteration_bounds = array<i64: 1>, scalar_prefetch = 0 : i64, scratch_operands = 0 : i64, tpu.core_type = #tpu.core_type<tc>, window_params = [{transform_indices = @transform_0, window_bounds = array<i64: 16, 16>}, {pipeline_mode = #tpu.pipeline_mode<synchronous>, transform_indices = @transform_1, window_bounds = array<i64: 16, 128>}, {pipeline_mode = #tpu.pipeline_mode<synchronous>, transform_indices = @transform_2, window_bounds = array<i64: 1, 128>}, {transform_indices = @transform_3, window_bounds = array<i64: 16, 128>}]} {
    %c0 = arith.constant 0 : index
    %c0_0 = arith.constant 0 : index
    %0 = vector.load %arg1[%c0, %c0_0] : memref<16x16xbf16, #tpu.memory_space<vmem>>, vector<16x16xbf16>
    %c0_1 = arith.constant 0 : index
    %c0_2 = arith.constant 0 : index
    %1 = vector.load %arg2[%c0_1, %c0_2] : memref<16x128xbf16, #tpu.memory_space<vmem>>, vector<16x128xbf16>
    %cst = arith.constant dense<0.000000e+00> : vector<16x128xf32>
    %2 = tpu.matmul %0, %1, %cst {dimension_numbers = #tpu.dot_dimension_numbers<[1], [0], [0], [1], [0, 0, 1, 1], [], []>} : vector<16x16xbf16>, vector<16x128xbf16>, vector<16x128xf32> -> vector<16x128xf32>
    %c0_3 = arith.constant 0 : index
    %c0_4 = arith.constant 0 : index
    %3 = vector.load %arg3[%c0_3, %c0_4] : memref<1x128xf32, #tpu.memory_space<vmem>>, vector<1x128xf32>
    %4 = vector.broadcast %3 : vector<1x128xf32> to vector<16x128xf32>
    %5 = arith.addf %2, %4 : vector<16x128xf32>
    %c0_5 = arith.constant 0 : index
    %c0_6 = arith.constant 0 : index
    %6 = vector.load %arg4[%c0_5, %c0_6] : memref<16x128xf32, #tpu.memory_space<vmem>>, vector<16x128xf32>
    tpu.vector_store %arg4[%c0_5, %c0_6], %5 {strides = array<i32>} : memref<16x128xf32, #tpu.memory_space<vmem>>, vector<16x128xf32>,
    return
  }
  func.func @transform_0(%arg0: i32) -> (i32, i32) {
    %c0_i32 = arith.constant 0 : i32
    %c0_i32_0 = arith.constant 0 : i32
    return %arg0, %c0_i32 : i32, i32
  }
  func.func @transform_1(%arg0: i32) -> (i32, i32) {
    %c0_i32 = arith.constant 0 : i32
    %c0_i32_0 = arith.constant 0 : i32
    %c0_i32_1 = arith.constant 0 : i32
    return %c0_i32, %c0_i32_0 : i32, i32
  }
  func.func @transform_2(%arg0: i32) -> (i32, i32) {
    %c0_i32 = arith.constant 0 : i32
    %c0_i32_0 = arith.constant 0 : i32
    %c0_i32_1 = arith.constant 0 : i32
    return %c0_i32, %c0_i32_0 : i32, i32
  }
  func.func @transform_3(%arg0: i32) -> (i32, i32) {
    %c0_i32 = arith.constant 0 : i32
    %c0_i32_0 = arith.constant 0 : i32
    return %arg0, %c0_i32 : i32, i32
  }
}

</mosaic_0001>

<bundles_post_ra>
// kernel: fwd1.4
= control target key start
LH: loop header
LB: loop body
LE: loop exit
PB: predicated region body
PF: predicated region fallthrough
CT: control target
= control target key end

     0   :  { %s200_s1 = inlined_call_operand.vmem [shape: bf16[128,128], index: 1, kind: input, shape index: {}]   ;;  %s201_s0 = inlined_call_operand.vmem [shape: bf16[16,128], index: 0, kind: input, shape index: {}]   ;;  %s202_s2 = inlined_call_operand.vmem [shape: bf16[16,128], index: 2, kind: output, shape index: {}]  }
   0x1   :  { %v149_v0 = vld [vmem:[%s200_s1 + $0x38] sm:$0xff]  ;;  %v148_v1 = vld [vmem:[%s200_s1 + $0x30] sm:$0xff]  ;;  %v147_v2 = vld [vmem:[%s200_s1 + $0x28] sm:$0xff] }
   0x2   :  { %83 = vmatpush.bf16.msra.mxu0 %v149_v0  ;;  %v146_v3 = vld [vmem:[%s200_s1 + $0x20] sm:$0xff]  ;;  %v145_v4 = vld [vmem:[%s200_s1 + $0x18] sm:$0xff]  ;;  %v144_v5 = vld [vmem:[%s200_s1 + $0x10] sm:$0xff] }
   0x3   :  { %v143_v6 = vld [vmem:[%s200_s1 + $0x8] sm:$0xff]  ;;  %v142_v7 = vld [vmem:[%s200_s1] sm:$0xff] }
   0x4   :  { %v141_v8 = vld [vmem:[%s201_s0] sm:$0xff] }
   0x6   :  { %84 = vmatpush.bf16.msra.mxu0 %v148_v1 }
   0xa   :  { %85 = vmatpush.bf16.msra.mxu0 %v147_v2 }
   0xe   :  { %86 = vmatpush.bf16.msra.mxu0 %v146_v3 }
  0x12   :  { %87 = vmatpush.bf16.msra.mxu0 %v145_v4 }
  0x16   :  { %88 = vmatpush.bf16.msra.mxu0 %v144_v5 }
  0x1a   :  { %89 = vmatpush.bf16.msra.mxu0 %v143_v6 }
  0x1e   :  { %90 = vmatpush.bf16.msra.mxu0 %v142_v7 }
  0x21   :  { %91 = vmatmul.bf16.vlgmr.msra.gmra.mxu0 %v141_v8 }
  0x9e   :  { %v92_v9 = vpop.f32.mrf.mxu0 }
  0xa6   :  { %v94_v10 = vpop.f32.mrf.mxu0 }
  0xa7   :  { %v153_v11 = vpack.c.bf16 %v94_v10, %v92_v9 }
  0xa9   :  { %154 = vst [vmem:[%s202_s2] sm:$0xff] %v153_v11  }

// kernel: fwd1.5
= control target key start
LH: loop header
LB: loop body
LE: loop exit
PB: predicated region body
PF: predicated region fallthrough
CT: control target
= control target key end

     0   :  { %vm34_vm0 = vcmask 130048   ;;  %s111_s1 = inlined_call_operand.vmem [shape: bf16[16,128], index: 1, kind: input, shape index: {}]   ;;  %s112_s0 = inlined_call_operand.vmem [shape: bf16[16,16], index: 0, kind: input, shape index: {}]   ;;  %s113_s2 = inlined_call_operand.vmem [shape: f32[1,128], index: 2, kind: input, shape index: {}]   ;;  %s114_s3 = inlined_call_operand.vmem [shape: bf16[16,128], index: 3, kind: output, shape index: {}]  }
   0x1   :  { %v72_v0 = vld [vmem:[%s111_s1] sm:$0xff] }
   0x2   :  { %v71_v1 = vld [vmem:[%s112_s0] sm:$0xff]  ;;  %45 = vmatpush.bf16.msra.mxu0 %v72_v0 }
   0x3   :  { %v78_v3 = vld [vmem:[%s113_s2] ss:$0 sm:$0xff] }
   0x5   :  { %70 = vmatmul.msk.bf16.vlgmr.msra.gmra.mxu0 %vm34_vm0, %v71_v1 }
  0x82   :  { %v47_v2 = vpop.f32.mrf.mxu0 }
  0x83   :  { %v48_v4 = vadd.f32 %v78_v3, %v47_v2 }
  0x85   :  { %v52_v7 = vmax.f32 %v48_v4, 0.0 }
  0x8a   :  { %v49_v5 = vpop.f32.mrf.mxu0 }
  0x8b   :  { %v50_v6 = vadd.f32 %v78_v3, %v49_v5 }
  0x8d   :  { %v53_v8 = vmax.f32 %v50_v6, 0.0 }
  0x8f   :  { %v76_v9 = vpack.c.bf16 %v53_v8, %v52_v7 }
  0x91   :  { %77 = vst [vmem:[%s114_s3] sm:$0xff] %v76_v9  }

// kernel: fwd1.7
= control target key start
LH: loop header
LB: loop body
LE: loop exit
PB: predicated region body
PF: predicated region fallthrough
CT: control target
= control target key end

     0   :  { %s149_s0 = inlined_call_operand.vmem [shape: bf16[16,16], index: 0, kind: input, shape index: {}]   ;;  %s150_s1 = inlined_call_operand.vmem [shape: bf16[16,128], index: 1, kind: input, shape index: {}]   ;;  %s151_s2 = inlined_call_operand.vmem [shape: f32[1,128], index: 2, kind: input, shape index: {}]   ;;  %s152_s3 = inlined_call_operand.hbm [shape: f32[16,128], index: 3, kind: output, shape index: {}]  }
   0x1   :  { %v83_v0 = vld [vmem:[%s150_s1] sm:$0xff] }
   0x2   :  { %v82_v1 = vld [vmem:[%s149_s0] sm:$0xff] }
   0x3   :  { %8 = vsyncpa [#allocation3], 0  ;;  %46 = vmatpush.bf16.msra.mxu0 %v83_v0  ;;  %vm35_vm0 = vcmask 130048   ;;  %v87_v2 = vld [vmem:[%s151_s2] ss:$0 sm:$0xff]  ;;  %s114_s18 = smov [#allocation2]  }
   0x4   :  { %s59_s19 = sshll.u32 %s114_s18, 4  ;;  %s61_s1 = sshll.u32 %s152_s3, 4  ;;  %s60_s19 = int_to_ptr.vmem [resolvable:$true] %s59_s19  ;;  %s62_s1 = int_to_ptr.hbm [resolvable:$true] %s61_s1 }
   0x5   :  { %s115_s0 = smov 128   ;;  %s116_s22 = smov 8  }
   0x6   :  { %81 = vmatmul.msk.bf16.vlgmr.msra.gmra.mxu0 %vm35_vm0, %v82_v1 }
  0x83   :  { %v48_v3 = vpop.f32.mrf.mxu0 }
  0x84   :  { %v49_v4 = vadd.f32 %v87_v2, %v48_v3 }
  0x86   :  { %53 = vst [vmem:[#allocation2] sm:$0xff] %v49_v4 }
  0x8b   :  { %v50_v5 = vpop.f32.mrf.mxu0 }
  0x8c   :  { %v51_v6 = vadd.f32 %v87_v2, %v50_v5 }
  0x8e   :  { %54 = vst [vmem:[#allocation2 + $0x8] sm:$0xff] %v51_v6 }
  0x8f   :  { %67 = dma.vmem_to_hbm [thread:$0]  %s60_s19, 256, %s62_s1, [#allocation3], %s115_s0, %s115_s0, %s116_s22  }
  0x90   :  { %112 = dma.done.wait [#allocation3], 256  }
  0x91   :  { %113 = vsyncadd [#allocation3], 4294967040 }
  0x92   :  { %72 = vsyncpa [#allocation3], 1 }

</bundles_post_ra>
